<compile_context>
chip_gen: v5e
topology: v5e:2x2
jax: 0.10.0
libtpu: 0.0.40
codegen_flags: <defaults>
</compile_context>

<pallas_src>
import functools

import jax
import jax.numpy as jnp
from jax.experimental import pallas as pl
from jax.experimental.pallas import tpu as pltpu


def _round_up(x: int, m: int) -> int:
    return ((x + m - 1) // m) * m


def _mlp_kernel(x_ref, w1_ref, b1_ref, w23_ref, b23_ref, out_ref):
    # fc1 + ReLU. Padded hidden columns have zero weights/bias -> stay 0 through ReLU and
    # contribute nothing via the zero rows of w23.
    h1 = jnp.dot(x_ref[...], w1_ref[...], preferred_element_type=jnp.float32) + b1_ref[...]
    h1 = jnp.maximum(h1, 0.0)
    # fused fc2+fc3 (single linear map, folded once in prepare_params)
    out = jnp.dot(h1, w23_ref[...], preferred_element_type=jnp.float32) + b23_ref[...]
    out_ref[...] = out.astype(out_ref.dtype)


def prepare_params(params):
    """One-time parameter preparation (run at init / whenever params change).

    Folds fc2 and fc3 into a single linear map (no nonlinearity between them):
        W23 = w2 @ w3,  b23 = b2 @ w3 + b3
    and zero-pads the hidden dim to lane width (100 -> 128). The output/action dim is
    deliberately left unpadded (see perf notes above).
    """
    w1, b1, w2, b2, w3, b3 = params
    K, H = w1.shape
    N = w3.shape[1]

    w23 = w2 @ w3                      # (H, N)
    b23 = b2 @ w3 + b3                 # (1, N)

    Hp = _round_up(H, 128)
    w1p = jnp.zeros((K, Hp), jnp.float32).at[:, :H].set(w1)
    b1p = jnp.zeros((1, Hp), jnp.float32).at[:, :H].set(b1)
    w23p = jnp.zeros((Hp, N), jnp.float32).at[:H, :].set(w23)
    b23p = b23.astype(jnp.float32)

    return (w1p, b1p, w23p, b23p)


@functools.partial(jax.jit, static_argnames=("batch_tile",))
def neural_net_forward(x, prepared, *, batch_tile: int = 2048):
    """Fused forward pass. x: (B, input_size) f32, prepared = prepare_params(params).

    Returns (B, num_actions) f32. Hot path = one pallas_call (+ batch pad/slice only if needed).
    """
    w1p, b1p, w23p, b23p = prepared
    B, K = x.shape
    Hp = w1p.shape[1]
    N = w23p.shape[1]

    # --- Batch tile selection (all static under jit: derived from shapes). ---
    TB = min(batch_tile, _round_up(B, 8))
    Bp = _round_up(B, 8)
    if Bp >= 16:
        # v7x megacore: guarantee >= 2 grid steps so both TensorCores get work.
        half = _round_up((Bp + 1) // 2, 8)
        TB = min(TB, half)
    Bp = _round_up(B, TB)

    xp = x if Bp == B else jnp.zeros((Bp, K), x.dtype).at[:B, :].set(x)

    grid = (Bp // TB,)
    resident = lambda shape: pl.BlockSpec(shape, lambda i: (0, 0))  # VMEM-resident across steps

    out_padded = pl.pallas_call(
        _mlp_kernel,
        out_shape=jax.ShapeDtypeStruct((Bp, N), jnp.float32),
        grid=grid,
        in_specs=[
            pl.BlockSpec((TB, K), lambda i: (i, 0)),   # x: streamed per batch tile
            resident((K, Hp)),                         # w1 (hidden-padded)
            resident((1, Hp)),                         # b1 (hidden-padded)
            resident((Hp, N)),                         # fused w2@w3
            resident((1, N)),                          # fused bias
        ],
        out_specs=pl.BlockSpec((TB, N), lambda i: (i, 0)),  # unpadded action dim (full array dim)
        compiler_params=pltpu.CompilerParams(
            dimension_semantics=("parallel",),         # megacore split on v7x; no-op elsewhere
        ),
    )(xp, w1p, b1p, w23p, b23p)

    return out_padded if Bp == B else out_padded[:B, :]


def init_params(key, input_size, hidden_size, num_actions):
    """Deterministic init mimicking nn.Linear's uniform(-1/sqrt(fan_in), 1/sqrt(fan_in)).

    Weights are stored as (in_features, out_features) so the kernel computes x @ W + b;
    biases are kept 2-D (1, out_features) for TPU layout.
    """
    dims = [(input_size, hidden_size), (hidden_size, 10), (10, num_actions)]
    params = []
    keys = jax.random.split(key, 2 * len(dims))
    for i, (fan_in, fan_out) in enumerate(dims):
        bound = 1.0 / jnp.sqrt(jnp.float32(fan_in))
        w = jax.random.uniform(keys[2 * i], (fan_in, fan_out), jnp.float32, -bound, bound)
        b = jax.random.uniform(keys[2 * i + 1], (1, fan_out), jnp.float32, -bound, bound)
        params += [w, b]
    return tuple(params)


if __name__ == "__main__":
    # Small shapes consistent with a gym env (e.g. CartPole-like): obs dim 4, 2 actions.
    batch = 8
    input_size = 4
    hidden_size = 100
    num_actions = 2

    key = jax.random.PRNGKey(0)
    k_x, k_p = jax.random.split(key)
    x = jax.random.normal(k_x, (batch, input_size), dtype=jnp.float32)
    params = init_params(k_p, input_size, hidden_size, num_actions)

    # One-time parameter prep (fold + pad) outside the hot path.
    prepared = prepare_params(params)

    out = neural_net_forward(x, prepared)
    out = jax.block_until_ready(out)

    # Sanity check against a pure-JAX reference of the original (unfolded) forward pass.
    w1, b1, w2, b2, w3, b3 = params
    ref = jnp.maximum(x @ w1 + b1, 0.0) @ w2 + b2
    ref = ref @ w3 + b3
    assert out.shape == (batch, num_actions)
    assert jnp.allclose(out, ref, atol=1e-5, rtol=1e-5)

    print("KERNEL_OK")
</pallas_src>

<mosaic_0001>
module attributes {stable_mosaic.version = 11 : i64} {
  func.func @_mlp_kernel(%arg0: i32, %arg1: memref<8x4xf32, #tpu.memory_space<vmem>>, %arg2: memref<4x128xf32, #tpu.memory_space<vmem>>, %arg3: memref<1x128xf32, #tpu.memory_space<vmem>>, %arg4: memref<128x2xf32, #tpu.memory_space<vmem>>, %arg5: memref<1x2xf32, #tpu.memory_space<vmem>>, %arg6: memref<8x2xf32, #tpu.memory_space<vmem>>) attributes {dimension_semantics = [#tpu.dimension_semantics<parallel>], iteration_bounds = array<i64: 1>, scalar_prefetch = 0 : i64, scratch_operands = 0 : i64, tpu.core_type = #tpu.core_type<tc>, window_params = [{transform_indices = @transform_0, window_bounds = array<i64: 8, 4>}, {pipeline_mode = #tpu.pipeline_mode<synchronous>, transform_indices = @transform_1, window_bounds = array<i64: 4, 128>}, {pipeline_mode = #tpu.pipeline_mode<synchronous>, transform_indices = @transform_2, window_bounds = array<i64: 1, 128>}, {pipeline_mode = #tpu.pipeline_mode<synchronous>, transform_indices = @transform_3, window_bounds = array<i64: 128, 2>}, {pipeline_mode = #tpu.pipeline_mode<synchronous>, transform_indices = @transform_4, window_bounds = array<i64: 1, 2>}, {transform_indices = @transform_5, window_bounds = array<i64: 8, 2>}]} {
    %c0 = arith.constant 0 : index
    %c0_0 = arith.constant 0 : index
    %0 = vector.load %arg1[%c0, %c0_0] : memref<8x4xf32, #tpu.memory_space<vmem>>, vector<8x4xf32>
    %c0_1 = arith.constant 0 : index
    %c0_2 = arith.constant 0 : index
    %1 = vector.load %arg2[%c0_1, %c0_2] : memref<4x128xf32, #tpu.memory_space<vmem>>, vector<4x128xf32>
    %cst = arith.constant dense<0.000000e+00> : vector<8x128xf32>
    %2 = tpu.matmul %0, %1, %cst {dimension_numbers = #tpu.dot_dimension_numbers<[1], [0], [0], [1], [0, 0, 1, 1], [], []>} : vector<8x4xf32>, vector<4x128xf32>, vector<8x128xf32> -> vector<8x128xf32>
    %c0_3 = arith.constant 0 : index
    %c0_4 = arith.constant 0 : index
    %3 = vector.load %arg3[%c0_3, %c0_4] : memref<1x128xf32, #tpu.memory_space<vmem>>, vector<1x128xf32>
    %4 = vector.broadcast %3 : vector<1x128xf32> to vector<8x128xf32>
    %5 = arith.addf %2, %4 : vector<8x128xf32>
    %cst_5 = arith.constant 0.000000e+00 : f32
    %6 = vector.broadcast %cst_5 : f32 to vector<8x128xf32>
    %7 = arith.maximumf %5, %6 : vector<8x128xf32>
    %c0_6 = arith.constant 0 : index
    %c0_7 = arith.constant 0 : index
    %8 = vector.load %arg4[%c0_6, %c0_7] : memref<128x2xf32, #tpu.memory_space<vmem>>, vector<128x2xf32>
    %cst_8 = arith.constant dense<0.000000e+00> : vector<8x2xf32>
    %9 = tpu.matmul %7, %8, %cst_8 {dimension_numbers = #tpu.dot_dimension_numbers<[1], [0], [0], [1], [0, 0, 1, 1], [], []>} : vector<8x128xf32>, vector<128x2xf32>, vector<8x2xf32> -> vector<8x2xf32>
    %c0_9 = arith.constant 0 : index
    %c0_10 = arith.constant 0 : index
    %10 = vector.load %arg5[%c0_9, %c0_10] : memref<1x2xf32, #tpu.memory_space<vmem>>, vector<1x2xf32>
    %11 = vector.broadcast %10 : vector<1x2xf32> to vector<8x2xf32>
    %12 = arith.addf %9, %11 : vector<8x2xf32>
    %c0_11 = arith.constant 0 : index
    %c0_12 = arith.constant 0 : index
    %13 = vector.load %arg6[%c0_11, %c0_12] : memref<8x2xf32, #tpu.memory_space<vmem>>, vector<8x2xf32>
    tpu.vector_store %arg6[%c0_11, %c0_12], %12 {strides = array<i32>} : memref<8x2xf32, #tpu.memory_space<vmem>>, vector<8x2xf32>,
    return
  }
  func.func @transform_0(%arg0: i32) -> (i32, i32) {
    %c0_i32 = arith.constant 0 : i32
    %c0_i32_0 = arith.constant 0 : i32
    return %arg0, %c0_i32 : i32, i32
  }
  func.func @transform_1(%arg0: i32) -> (i32, i32) {
    %c0_i32 = arith.constant 0 : i32
    %c0_i32_0 = arith.constant 0 : i32
    %c0_i32_1 = arith.constant 0 : i32
    return %c0_i32, %c0_i32_0 : i32, i32
  }
  func.func @transform_2(%arg0: i32) -> (i32, i32) {
    %c0_i32 = arith.constant 0 : i32
    %c0_i32_0 = arith.constant 0 : i32
    %c0_i32_1 = arith.constant 0 : i32
    return %c0_i32, %c0_i32_0 : i32, i32
  }
  func.func @transform_3(%arg0: i32) -> (i32, i32) {
    %c0_i32 = arith.constant 0 : i32
    %c0_i32_0 = arith.constant 0 : i32
    %c0_i32_1 = arith.constant 0 : i32
    return %c0_i32, %c0_i32_0 : i32, i32
  }
  func.func @transform_4(%arg0: i32) -> (i32, i32) {
    %c0_i32 = arith.constant 0 : i32
    %c0_i32_0 = arith.constant 0 : i32
    %c0_i32_1 = arith.constant 0 : i32
    return %c0_i32, %c0_i32_0 : i32, i32
  }
  func.func @transform_5(%arg0: i32) -> (i32, i32) {
    %c0_i32 = arith.constant 0 : i32
    %c0_i32_0 = arith.constant 0 : i32
    return %arg0, %c0_i32 : i32, i32
  }
}

</mosaic_0001>

<bundles_post_ra>
// kernel: neural_net_forward.1
= control target key start
LH: loop header
LB: loop body
LE: loop exit
PB: predicated region body
PF: predicated region fallthrough
CT: control target
= control target key end

     0   :  { %vm30_vm0 = vcmask 1043456   ;;  %vm26_vm1 = vcmask 31744   ;;  %vm95_vm2 = vcmask 15360   ;;  %s198_s1 = inlined_call_operand.vmem [shape: f32[4,128], index: 1, kind: input, shape index: {}]   ;;  %s199_s0 = inlined_call_operand.vmem [shape: f32[8,4], index: 0, kind: input, shape index: {}]   ;;  %s200_s3 = inlined_call_operand.vmem [shape: f32[128,2], index: 3, kind: input, shape index: {}]   ;;  %s201_s2 = inlined_call_operand.vmem [shape: f32[1,128], index: 2, kind: input, shape index: {}]   ;;  %s202_s4 = inlined_call_operand.vmem [shape: f32[1,2], index: 4, kind: input, shape index: {}]   ;;  %s203_s5 = inlined_call_operand.vmem [shape: f32[8,2], index: 5, kind: output, shape index: {}]  }
   0x1   :  { %v21_v0 = vld [vmem:[%s198_s1] sm:$0xf]  ;;  %v70_v2 = vld [vmem:[%s200_s3 + $0x78] sm:$0xff]  ;;  %v69_v3 = vld [vmem:[%s200_s3 + $0x70] sm:$0xff] }
   0x2   :  { %v20_v1 = vld [vmem:[%s199_s0] sm:$0xff]  ;;  %101 = vmatpush.msk.msra.mxu0 %vm30_vm0, %v21_v0  ;;  %75 = vmatpush.msra.mxu1 %v70_v2  ;;  %v68_v4 = vld [vmem:[%s200_s3 + $0x68] sm:$0xff]  ;;  %v66_v6 = vld [vmem:[%s200_s3 + $0x58] sm:$0xff] }
   0x3   :  { %102 = vmatmul.msk.f32.vlgmr.msra.gmra.mxu0 %vm26_vm1, %v20_v1  ;;  %v67_v5 = vld [vmem:[%s200_s3 + $0x60] sm:$0xff]  ;;  %v65_v7 = vld [vmem:[%s200_s3 + $0x50] sm:$0xff]  ;;  %v64_v8 = vld [vmem:[%s200_s3 + $0x48] sm:$0xff] }
   0x4   :  { %76 = vmatpush.msra.mxu1 %v69_v3  ;;  %v63_v9 = vld [vmem:[%s200_s3 + $0x40] sm:$0xff]  ;;  %v62_v10 = vld [vmem:[%s200_s3 + $0x38] sm:$0xff]  ;;  %v61_v11 = vld [vmem:[%s200_s3 + $0x30] sm:$0xff] }
   0x5   :  { %v60_v12 = vld [vmem:[%s200_s3 + $0x28] sm:$0xff]  ;;  %v59_v13 = vld [vmem:[%s200_s3 + $0x20] sm:$0xff]  ;;  %v58_v14 = vld [vmem:[%s200_s3 + $0x18] sm:$0xff] }
   0x6   :  { %77 = vmatpush.msra.mxu1 %v68_v4  ;;  %v57_v15 = vld [vmem:[%s200_s3 + $0x10] sm:$0xff]  ;;  %v56_v16 = vld [vmem:[%s200_s3 + $0x8] sm:$0xff]  ;;  %v55_v17 = vld [vmem:[%s200_s3] sm:$0xff] }
   0x7   :  { %v103_v18 = vld [vmem:[%s201_s2] ss:$0 sm:$0xff] }
   0x8   :  { %78 = vmatpush.msra.mxu1 %v67_v5  ;;  %v104_v22 = vld [vmem:[%s202_s4] ss:$0 sm:$0xff] }
   0xa   :  { %79 = vmatpush.msra.mxu1 %v66_v6 }
   0xc   :  { %80 = vmatpush.msra.mxu1 %v65_v7 }
   0xe   :  { %81 = vmatpush.msra.mxu1 %v64_v8 }
  0x10   :  { %82 = vmatpush.msra.mxu1 %v63_v9 }
  0x12   :  { %83 = vmatpush.msra.mxu1 %v62_v10 }
  0x14   :  { %84 = vmatpush.msra.mxu1 %v61_v11 }
  0x16   :  { %85 = vmatpush.msra.mxu1 %v60_v12 }
  0x18   :  { %86 = vmatpush.msra.mxu1 %v59_v13 }
  0x1a   :  { %87 = vmatpush.msra.mxu1 %v58_v14 }
  0x1c   :  { %88 = vmatpush.msra.mxu1 %v57_v15 }
  0x1e   :  { %89 = vmatpush.msra.mxu1 %v56_v16 }
  0x20   :  { %90 = vmatpush.msra.mxu1 %v55_v17 }
  0x80   :  { %v51_v19 = vpop.f32.mrf.mxu0 }
  0x81   :  { %v52_v20 = vadd.f32 %v103_v18, %v51_v19 }
  0x83   :  { %v54_v21 = vmax.f32 %v52_v20, 0.0 }
  0x85   :  { %91 = vmatmul.f32.vlgmr.msra.gmra.mxu1 %v54_v21 }
 0x102   :  { %v92_v23 = vpop.f32.mrf.mxu1 }
 0x103   :  { %v93_v24 = vadd.f32 %v104_v22, %v92_v23 }
 0x105   :  { %96 = vst.msk [vmem:[%s203_s5] sm:$0xff] %vm95_vm2, %v93_v24 }

</bundles_post_ra>
